<compile_context>
chip_gen: v7x
topology: tpu7x:2x2x1
jax: 0.10.0
libtpu: 0.0.40
codegen_flags: <defaults>
</compile_context>

<pallas_src>
import jax
import jax.numpy as jnp
from jax.experimental import pallas as pl
from jax.experimental.pallas import tpu as pltpu


def _densenet_large_head_kernel(x_ref, w_ref, b_ref, o_ref):
    """Head for one batch tile.

    x_ref : (TN, C, HW)  backbone feature maps, NCHW flattened over HxW
    w_ref : (C, Kp)      classifier weight (transposed, lane-padded to Kp)
    b_ref : (1, Kp)      classifier bias (lane-padded)
    o_ref : (TN, Kp)     logits (lane-padded)
    """
    hw = x_ref.shape[-1]
    # F.relu(features)  (accumulate the pool in f32 even if features are bf16)
    feats = jnp.maximum(x_ref[...], 0.0).astype(jnp.float32)
    # avg_pool2d(kernel_size=8, stride=1) on an 8x8 map == global spatial mean.
    pooled = jnp.sum(feats, axis=-1) * (1.0 / hw)            # (TN, C)
    # nn.Linear: one batched MXU matmul per grid step.
    logits = jnp.dot(pooled.astype(w_ref.dtype), w_ref[...],
                     preferred_element_type=jnp.float32)     # (TN, Kp)
    o_ref[...] = logits + b_ref[...]


def convnet_model_head(features_nchw, w_t, b,
                       *, vmem_budget_per_buffer=8 * 1024 * 1024):
    """DENSENET*-LARGE head: relu -> avg_pool2d(8, stride=1) -> flatten -> Linear.

    features_nchw : (N, C, H, W) backbone feature map (H == W == 8)
    w_t           : (C, K)       nn.Linear weight, stored transposed
    b             : (K,)         nn.Linear bias
    returns       : (N, K)       logits
    """
    N, C, H, W = features_nchw.shape
    # avg_pool2d(8, stride=1) collapses to a global mean only for an 8x8 map,
    # which is what the -LARGE variants are configured for.
    # TODO(synk): implement the true sliding 8x8/9x9/10x10 pool for the
    # LARGE2/LARGE3 variants or H, W > 8 feature maps.
    assert H == 8 and W == 8, "DENSENET*-LARGE head expects an 8x8 feature map"
    HW = H * W
    K = w_t.shape[1]

    # Pure reshape only — no NCHW->NHWC transpose / extra HBM copy.
    x = features_nchw.reshape(N, C, HW)

    # Lane-dense output: pad K up to a multiple of 128 (unmasked stores).
    Kp = max(128, pl.cdiv(K, 128) * 128)
    w_p = jnp.zeros((C, Kp), w_t.dtype).at[:, :K].set(w_t)
    b_p = jnp.zeros((1, Kp), jnp.float32).at[0, :K].set(b.astype(jnp.float32))

    # Batch-tile size: biggest tile whose double-buffered input stays inside a
    # conservative per-buffer budget (fits the default scoped-VMEM limit on
    # v5e/v6e and the 64 MiB VMEM of a v7x TensorCore).
    per_image_bytes = C * HW * features_nchw.dtype.itemsize
    tn = max(1, vmem_budget_per_buffer // per_image_bytes)
    tn = int(min(tn, N, 256))
    if tn < N:
        tn = max(8, (tn // 8) * 8)            # keep output sublane dim 8-aligned
    n_pad = pl.cdiv(N, tn) * tn
    if n_pad != N:
        x = jnp.pad(x, ((0, n_pad - N), (0, 0), (0, 0)))

    out = pl.pallas_call(
        _densenet_large_head_kernel,
        out_shape=jax.ShapeDtypeStruct((n_pad, Kp), jnp.float32),
        grid_spec=pltpu.PrefetchScalarGridSpec(
            num_scalar_prefetch=0,
            grid=(n_pad // tn,),
            in_specs=[
                pl.BlockSpec((tn, C, HW), lambda i: (i, 0, 0)),  # batch tile
                pl.BlockSpec((C, Kp), lambda i: (0, 0)),         # weight: fetched once
                pl.BlockSpec((1, Kp), lambda i: (0, 0)),         # bias: fetched once
            ],
            out_specs=pl.BlockSpec((tn, Kp), lambda i: (i, 0)),
        ),
        compiler_params=pltpu.CompilerParams(
            dimension_semantics=("parallel",)),   # megacore-shardable on v7x
    )(x, w_p, b_p)
    return out[:N, :K]


if __name__ == "__main__":
    # Small shapes consistent with the DENSENET121-LARGE head: (N, C, 8, 8)
    # backbone feature map (C scaled down from 1024 -> 128), class_count = 14.
    N, C, H, W = 4, 128, 8, 8
    class_count = 14

    key = jax.random.PRNGKey(0)
    k_x, k_w, k_b = jax.random.split(key, 3)

    features = jax.random.normal(k_x, (N, C, H, W), dtype=jnp.float32)
    # nn.Linear(kernel_count, class_count) parameters, stored transposed (C, K).
    w_t = jax.random.normal(k_w, (C, class_count), dtype=jnp.float32) * 0.02
    b = jax.random.normal(k_b, (class_count,), dtype=jnp.float32) * 0.02

    logits = jax.block_until_ready(convnet_model_head(features, w_t, b))

    # Pure-JAX reference of the module-defined forward.
    ref = jnp.mean(jnp.maximum(features, 0.0), axis=(2, 3)) @ w_t + b
    assert logits.shape == (N, class_count)
    assert jnp.allclose(logits, ref, atol=1e-5, rtol=1e-5), "mismatch vs reference"

    print("KERNEL_OK")
</pallas_src>

<mosaic_0001>
module attributes {stable_mosaic.version = 11 : i64} {
  func.func @_densenet_large_head_kernel(%arg0: i32, %arg1: memref<4x128x64xf32, #tpu.memory_space<vmem>>, %arg2: memref<128x128xf32, #tpu.memory_space<vmem>>, %arg3: memref<1x128xf32, #tpu.memory_space<vmem>>, %arg4: memref<4x128xf32, #tpu.memory_space<vmem>>) attributes {dimension_semantics = [#tpu.dimension_semantics<parallel>], iteration_bounds = array<i64: 1>, scalar_prefetch = 0 : i64, scratch_operands = 0 : i64, tpu.core_type = #tpu.core_type<tc>, window_params = [{transform_indices = @transform_0, window_bounds = array<i64: 4, 128, 64>}, {pipeline_mode = #tpu.pipeline_mode<synchronous>, transform_indices = @transform_1, window_bounds = array<i64: 128, 128>}, {pipeline_mode = #tpu.pipeline_mode<synchronous>, transform_indices = @transform_2, window_bounds = array<i64: 1, 128>}, {transform_indices = @transform_3, window_bounds = array<i64: 4, 128>}]} {
    %c0 = arith.constant 0 : index
    %c0_0 = arith.constant 0 : index
    %c0_1 = arith.constant 0 : index
    %0 = vector.load %arg1[%c0, %c0_0, %c0_1] : memref<4x128x64xf32, #tpu.memory_space<vmem>>, vector<4x128x64xf32>
    %cst = arith.constant 0.000000e+00 : f32
    %1 = vector.broadcast %cst : f32 to vector<4x128x64xf32>
    %2 = arith.maximumf %0, %1 : vector<4x128x64xf32>
    %cst_2 = arith.constant dense<0.000000e+00> : vector<4x128xf32>
    %3 = vector.multi_reduction <add>, %2, %cst_2 [2] : vector<4x128x64xf32> to vector<4x128xf32>
    %cst_3 = arith.constant 1.562500e-02 : f32
    %4 = vector.broadcast %cst_3 : f32 to vector<4x128xf32>
    %5 = arith.mulf %3, %4 : vector<4x128xf32>
    %c0_4 = arith.constant 0 : index
    %c0_5 = arith.constant 0 : index
    %6 = vector.load %arg2[%c0_4, %c0_5] : memref<128x128xf32, #tpu.memory_space<vmem>>, vector<128x128xf32>
    %cst_6 = arith.constant dense<0.000000e+00> : vector<4x128xf32>
    %7 = tpu.matmul %5, %6, %cst_6 {dimension_numbers = #tpu.dot_dimension_numbers<[1], [0], [0], [1], [0, 0, 1, 1], [], []>} : vector<4x128xf32>, vector<128x128xf32>, vector<4x128xf32> -> vector<4x128xf32>
    %c0_7 = arith.constant 0 : index
    %c0_8 = arith.constant 0 : index
    %8 = vector.load %arg3[%c0_7, %c0_8] : memref<1x128xf32, #tpu.memory_space<vmem>>, vector<1x128xf32>
    %9 = vector.broadcast %8 : vector<1x128xf32> to vector<4x128xf32>
    %10 = arith.addf %7, %9 : vector<4x128xf32>
    %c0_9 = arith.constant 0 : index
    %c0_10 = arith.constant 0 : index
    %11 = vector.load %arg4[%c0_9, %c0_10] : memref<4x128xf32, #tpu.memory_space<vmem>>, vector<4x128xf32>
    tpu.vector_store %arg4[%c0_9, %c0_10], %10 {strides = array<i32>} : memref<4x128xf32, #tpu.memory_space<vmem>>, vector<4x128xf32>,
    return
  }
  func.func @transform_0(%arg0: i32) -> (i32, i32, i32) {
    %c0_i32 = arith.constant 0 : i32
    %c0_i32_0 = arith.constant 0 : i32
    %c0_i32_1 = arith.constant 0 : i32
    return %arg0, %c0_i32, %c0_i32_0 : i32, i32, i32
  }
  func.func @transform_1(%arg0: i32) -> (i32, i32) {
    %c0_i32 = arith.constant 0 : i32
    %c0_i32_0 = arith.constant 0 : i32
    %c0_i32_1 = arith.constant 0 : i32
    return %c0_i32, %c0_i32_0 : i32, i32
  }
  func.func @transform_2(%arg0: i32) -> (i32, i32) {
    %c0_i32 = arith.constant 0 : i32
    %c0_i32_0 = arith.constant 0 : i32
    %c0_i32_1 = arith.constant 0 : i32
    return %c0_i32, %c0_i32_0 : i32, i32
  }
  func.func @transform_3(%arg0: i32) -> (i32, i32) {
    %c0_i32 = arith.constant 0 : i32
    %c0_i32_0 = arith.constant 0 : i32
    return %arg0, %c0_i32 : i32, i32
  }
}

</mosaic_0001>

<bundles_post_ra>
// kernel: tpu_custom_call.1
= control target key start
LH: loop header
LB: loop body
LE: loop exit
PB: predicated region body
PF: predicated region fallthrough
CT: control target
= control target key end

     0   :  { %vm143_vm0 = vcmask 523264   ;;  %s1623_s0 = inlined_call_operand.vmem [shape: f32[4,128,64], index: 0, kind: input, shape index: {}]   ;;  %s1624_s1 = inlined_call_operand.vmem [shape: f32[128,128], index: 1, kind: input, shape index: {}]   ;;  %s1625_s2 = inlined_call_operand.vmem [shape: f32[1,128], index: 2, kind: input, shape index: {}]   ;;  %s1626_s3 = inlined_call_operand.hbm [shape: f32[4,128], index: 3, kind: output, shape index: {}]  }
   0x1   :  { %v31_v0 = vld [vmem:[%s1623_s0 + $0x80] sm:$0xff]  ;;  %v32_v2 = vld [vmem:[%s1623_s0 + $0x88] sm:$0xff]  ;;  %v33_v8 = vld [vmem:[%s1623_s0 + $0x90] sm:$0xff] }
   0x2   :  { %v15_v1 = vld [vmem:[%s1623_s0] sm:$0xff]  ;;  %v95_v3 = vmax.f32 %v31_v0, 0.0  ;;  %v96_v5 = vmax.f32 %v32_v2, 0.0  ;;  %v16_v6 = vld [vmem:[%s1623_s0 + $0x8] sm:$0xff]  ;;  %v17_v9 = vld [vmem:[%s1623_s0 + $0x10] sm:$0xff]  ;;  %v97_v14 = vmax.f32 %v33_v8, 0.0 }
   0x3   :  { %v79_v4 = vmax.f32 %v15_v1, 0.0  ;;  %v80_v7 = vmax.f32 %v16_v6, 0.0  ;;  %v81_v15 = vmax.f32 %v17_v9, 0.0  ;;  %v48_v16 = vld [vmem:[%s1623_s0 + $0x108] sm:$0xff]  ;;  %v47_v17 = vld [vmem:[%s1623_s0 + $0x100] sm:$0xff]  ;;  %v34_v22 = vld [vmem:[%s1623_s0 + $0x98] sm:$0xff] }
   0x4   :  { %v192_v10 = vsel %vm143_vm0, %v95_v3, 0.0  ;;  %v195_v12 = vsel %vm143_vm0, %v96_v5, 0.0  ;;  %v198_v18 = vsel %vm143_vm0, %v97_v14, 0.0  ;;  %v112_v20 = vmax.f32 %v48_v16, 0.0  ;;  %v18_v23 = vld [vmem:[%s1623_s0 + $0x18] sm:$0xff]  ;;  %v63_v28 = vld [vmem:[%s1623_s0 + $0x180] sm:$0xff] }
   0x5   :  { %v144_v11 = vsel %vm143_vm0, %v79_v4, 0.0  ;;  %193 = vadd.xlane.f32.xlu1 %v192_v10  ;;  %v147_v13 = vsel %vm143_vm0, %v80_v7, 0.0  ;;  %v150_v19 = vsel %vm143_vm0, %v81_v15, 0.0  ;;  %v111_v21 = vmax.f32 %v47_v17, 0.0  ;;  %v49_v29 = vld [vmem:[%s1623_s0 + $0x110] sm:$0xff]  ;;  %v19_v34 = vld [vmem:[%s1623_s0 + $0x20] sm:$0xff] }
   0x6   :  { %145 = vadd.xlane.f32.xlu0 %v144_v11  ;;  %v243_v24 = vsel %vm143_vm0, %v112_v20, 0.0  ;;  %v98_v26 = vmax.f32 %v34_v22, 0.0  ;;  %v82_v27 = vmax.f32 %v18_v23, 0.0  ;;  %v127_v32 = vmax.f32 %v63_v28, 0.0  ;;  %v64_v35 = vld [vmem:[%s1623_s0 + $0x188] sm:$0xff]  ;;  %v50_v40 = vld [vmem:[%s1623_s0 + $0x118] sm:$0xff] }
   0x7   :  { %v240_v25 = vsel %vm143_vm0, %v111_v21, 0.0  ;;  %v113_v33 = vmax.f32 %v49_v29, 0.0  ;;  %v83_v38 = vmax.f32 %v19_v34, 0.0  ;;  %v128_v39 = vmax.f32 %v64_v35, 0.0  ;;  %v35_v41 = vld [vmem:[%s1623_s0 + $0xa0] sm:$0xff]  ;;  %v20_v46 = vld [vmem:[%s1623_s0 + $0x28] sm:$0xff] }
   0x8   :  { %v201_v30 = vsel %vm143_vm0, %v98_v26, 0.0  ;;  %v153_v31 = vsel %vm143_vm0, %v82_v27, 0.0  ;;  %v288_v36 = vsel %vm143_vm0, %v127_v32, 0.0  ;;  %v114_v44 = vmax.f32 %v50_v40, 0.0  ;;  %v65_v47 = vld [vmem:[%s1623_s0 + $0x190] sm:$0xff]  ;;  %v51_v52 = vld [vmem:[%s1623_s0 + $0x120] sm:$0xff] }
   0x9   :  { %196 = vadd.xlane.f32.xlu1 %v195_v12  ;;  %v246_v37 = vsel %vm143_vm0, %v113_v33, 0.0  ;;  %v156_v42 = vsel %vm143_vm0, %v83_v38, 0.0  ;;  %v291_v43 = vsel %vm143_vm0, %v128_v39, 0.0  ;;  %v99_v45 = vmax.f32 %v35_v41, 0.0  ;;  %v36_v53 = vld [vmem:[%s1623_s0 + $0xa8] sm:$0xff] }
   0xa   :  { %148 = vadd.xlane.f32.xlu0 %v147_v13  ;;  %v249_v48 = vsel %vm143_vm0, %v114_v44, 0.0  ;;  %v84_v50 = vmax.f32 %v20_v46, 0.0  ;;  %v129_v51 = vmax.f32 %v65_v47, 0.0 }
   0xb   :  { %v204_v49 = vsel %vm143_vm0, %v99_v45, 0.0 }
   0xd   :  { %199 = vadd.xlane.f32.xlu1 %v198_v18 }
   0xe   :  { %151 = vadd.xlane.f32.xlu0 %v150_v19 }
  0x11   :  { %244 = vadd.xlane.f32.xlu1 %v243_v24 }
  0x12   :  { %241 = vadd.xlane.f32.xlu0 %v240_v25 }
  0x15   :  { %202 = vadd.xlane.f32.xlu1 %v201_v30 }
  0x16   :  { %154 = vadd.xlane.f32.xlu0 %v153_v31 }
  0x19   :  { %289 = vadd.xlane.f32.xlu1 %v288_v36 }
  0x1a   :  { %247 = vadd.xlane.f32.xlu0 %v246_v37 }
  0x1d   :  { %157 = vadd.xlane.f32.xlu1 %v156_v42 }
  0x1e   :  { %292 = vadd.xlane.f32.xlu0 %v291_v43 }
  0x1f   :  { %8 = vsyncpa [#allocation3], 0  ;;  %v159_v54 = vsel %vm143_vm0, %v84_v50, 0.0  ;;  %v294_v55 = vsel %vm143_vm0, %v129_v51, 0.0  ;;  %v115_v56 = vmax.f32 %v51_v52, 0.0  ;;  %v100_v57 = vmax.f32 %v36_v53, 0.0 }
  0x20   :  { %v21_v58 = vld [vmem:[%s1623_s0 + $0x30] sm:$0xff]  ;;  %v66_v59 = vld [vmem:[%s1623_s0 + $0x198] sm:$0xff]  ;;  %v52_v0 = vld [vmem:[%s1623_s0 + $0x128] sm:$0xff]  ;;  %vm1033_vm1 = vmmov 0   ;;  %vm498_vm2 = vcmask 130112   ;;  %vm505_vm3 = vcmask 195712  }
  0x21   :  { %250 = vadd.xlane.f32.xlu1 %v249_v48  ;;  %v252_v60 = vsel %vm143_vm0, %v115_v56, 0.0  ;;  %v207_v61 = vsel %vm143_vm0, %v100_v57, 0.0  ;;  %v85_v62 = vmax.f32 %v21_v58, 0.0  ;;  %v130_v63 = vmax.f32 %v66_v59, 0.0  ;;  %v37_v1 = vld [vmem:[%s1623_s0 + $0xb0] sm:$0xff]  ;;  %v22_v6 = vld [vmem:[%s1623_s0 + $0x38] sm:$0xff] }
  0x22   :  { %205 = vadd.xlane.f32.xlu0 %v204_v49  ;;  %v116_v4 = vmax.f32 %v52_v0, 0.0  ;;  %v101_v5 = vmax.f32 %v37_v1, 0.0  ;;  %v67_v7 = vld [vmem:[%s1623_s0 + $0x1a0] sm:$0xff]  ;;  %v86_v10 = vmax.f32 %v22_v6, 0.0  ;;  %v53_v12 = vld [vmem:[%s1623_s0 + $0x130] sm:$0xff]  ;;  %v38_v13 = vld [vmem:[%s1623_s0 + $0xb8] sm:$0xff] }
  0x23   :  { %v162_v2 = vsel %vm143_vm0, %v85_v62, 0.0  ;;  %v297_v3 = vsel %vm143_vm0, %v130_v63, 0.0  ;;  %v131_v11 = vmax.f32 %v67_v7, 0.0  ;;  %v117_v16 = vmax.f32 %v53_v12, 0.0  ;;  %v23_v18 = vld [vmem:[%s1623_s0 + $0x40] sm:$0xff]  ;;  %v68_v19 = vld [vmem:[%s1623_s0 + $0x1a8] sm:$0xff] }
  0x24   :  { %v255_v8 = vsel %vm143_vm0, %v116_v4, 0.0  ;;  %v210_v9 = vsel %vm143_vm0, %v101_v5, 0.0  ;;  %v165_v14 = vsel %vm143_vm0, %v86_v10, 0.0  ;;  %v102_v17 = vmax.f32 %v38_v13, 0.0  ;;  %v54_v24 = vld [vmem:[%s1623_s0 + $0x138] sm:$0xff]  ;;  %v39_v25 = vld [vmem:[%s1623_s0 + $0xc0] sm:$0xff] }
  0x25   :  { %160 = vadd.xlane.f32.xlu1 %v159_v54  ;;  %v300_v15 = vsel %vm143_vm0, %v131_v11, 0.0  ;;  %v258_v20 = vsel %vm143_vm0, %v117_v16, 0.0  ;;  %v87_v22 = vmax.f32 %v23_v18, 0.0  ;;  %v132_v23 = vmax.f32 %v68_v19, 0.0  ;;  %v24_v30 = vld [vmem:[%s1623_s0 + $0x48] sm:$0xff]  ;;  %v69_v31 = vld [vmem:[%s1623_s0 + $0x1b0] sm:$0xff] }
  0x26   :  { %295 = vadd.xlane.f32.xlu0 %v294_v55  ;;  %v213_v21 = vsel %vm143_vm0, %v102_v17, 0.0  ;;  %v118_v28 = vmax.f32 %v54_v24, 0.0  ;;  %v103_v29 = vmax.f32 %v39_v25, 0.0  ;;  %v88_v34 = vmax.f32 %v24_v30, 0.0  ;;  %v55_v36 = vld [vmem:[%s1623_s0 + $0x140] sm:$0xff]  ;;  %v40_v37 = vld [vmem:[%s1623_s0 + $0xc8] sm:$0xff] }
  0x27   :  { %v168_v26 = vsel %vm143_vm0, %v87_v22, 0.0  ;;  %v303_v27 = vsel %vm143_vm0, %v132_v23, 0.0  ;;  %v133_v35 = vmax.f32 %v69_v31, 0.0  ;;  %v119_v40 = vmax.f32 %v55_v36, 0.0  ;;  %v25_v42 = vld [vmem:[%s1623_s0 + $0x50] sm:$0xff]  ;;  %v70_v43 = vld [vmem:[%s1623_s0 + $0x1b8] sm:$0xff] }
  0x28   :  { %v261_v32 = vsel %vm143_vm0, %v118_v28, 0.0  ;;  %v216_v33 = vsel %vm143_vm0, %v103_v29, 0.0  ;;  %v171_v38 = vsel %vm143_vm0, %v88_v34, 0.0  ;;  %v104_v41 = vmax.f32 %v40_v37, 0.0  ;;  %v56_v48 = vld [vmem:[%s1623_s0 + $0x148] sm:$0xff]  ;;  %v41_v49 = vld [vmem:[%s1623_s0 + $0xd0] sm:$0xff] }
  0x29   :  { %253 = vadd.xlane.f32.xlu1 %v252_v60  ;;  %v306_v39 = vsel %vm143_vm0, %v133_v35, 0.0  ;;  %v264_v44 = vsel %vm143_vm0, %v119_v40, 0.0  ;;  %v89_v46 = vmax.f32 %v25_v42, 0.0  ;;  %v134_v47 = vmax.f32 %v70_v43, 0.0  ;;  %v26_v54 = vld [vmem:[%s1623_s0 + $0x58] sm:$0xff]  ;;  %v71_v55 = vld [vmem:[%s1623_s0 + $0x1c0] sm:$0xff] }
  0x2a   :  { %208 = vadd.xlane.f32.xlu0 %v207_v61  ;;  %v219_v45 = vsel %vm143_vm0, %v104_v41, 0.0  ;;  %v120_v52 = vmax.f32 %v56_v48, 0.0  ;;  %v105_v53 = vmax.f32 %v41_v49, 0.0  ;;  %v90_v58 = vmax.f32 %v26_v54, 0.0  ;;  %v57_v60 = vld [vmem:[%s1623_s0 + $0x150] sm:$0xff]  ;;  %v42_v61 = vld [vmem:[%s1623_s0 + $0xd8] sm:$0xff] }
  0x2b   :  { %v174_v50 = vsel %vm143_vm0, %v89_v46, 0.0  ;;  %v309_v51 = vsel %vm143_vm0, %v134_v47, 0.0  ;;  %v135_v59 = vmax.f32 %v71_v55, 0.0  ;;  %v121_v0 = vmax.f32 %v57_v60, 0.0  ;;  %v77_v60 = vld [vmem:[%s1623_s0 + $0x1f0] sm:$0xff]  ;;  %s1035_s10 = smov [#allocation2]  }
  0x2c   :  { %v267_v56 = vsel %vm143_vm0, %v120_v52, 0.0  ;;  %v222_v57 = vsel %vm143_vm0, %v105_v53, 0.0  ;;  %v177_v62 = vsel %vm143_vm0, %v90_v58, 0.0  ;;  %v106_v1 = vmax.f32 %v42_v61, 0.0  ;;  %v400_v52 = vld [vmem:[%s1624_s1] sm:$0xff]  ;;  %v401_v53 = vld [vmem:[%s1624_s1 + $0x8] sm:$0xff] }
  0x2d   :  { %163 = vadd.xlane.f32.xlu1 %v162_v2  ;;  %v312_v63 = vsel %vm143_vm0, %v135_v59, 0.0  ;;  %v27_v2 = vld [vmem:[%s1623_s0 + $0x60] sm:$0xff]  ;;  %v270_v4 = vsel %vm143_vm0, %v121_v0, 0.0  ;;  %v981_v54 = vpack.c.bf16 %v401_v53, %v400_v52  ;;  %v1032_v59 = vmov 0.0|0.0   ;;  %v78_v61 = vld [vmem:[%s1623_s0 + $0x1f8] sm:$0xff]  ;;  %s919_s11 = sshll.u32 %s1035_s10, 4  ;;  %s920_s11 = int_to_ptr.vmem [resolvable:$true] %s919_s11 }
  0x2e   :  { %298 = vadd.xlane.f32.xlu0 %v297_v3  ;;  %v72_v3 = vld [vmem:[%s1623_s0 + $0x1c8] sm:$0xff]  ;;  %v225_v5 = vsel %vm143_vm0, %v106_v1, 0.0  ;;  %v91_v6 = vmax.f32 %v27_v2, 0.0  ;;  %980 = vmatprep.subr.bf16.mxu0 %v1032_v59  ;;  %vm512_vm4 = vcmask 261312   ;;  %vm519_vm5 = vcmask 326912   ;;  %s1008_s12 = scalar_lea.vmem %s920_s11, 64  ;;  %p1013_p1 = scmp.lt.s32.totalorder %s920_s11, %s920_s11 }
  0x2f   :  { %v136_v7 = vmax.f32 %v72_v3, 0.0  ;;  %982 = vmatpush3.bf16.msra.mxu0 %v981_v54  ;;  %v141_v3 = vmax.f32 %v77_v60, 0.0  ;;  %vm526_vm6 = vcmask 392512   ;;  %vm533_vm7 = vcmask 458112   ;;  %p1009_p0 = scmp.ne.s32.totalorder %s920_s11, %s1008_s12  ;;  %p1014_p2 = scmp.lt.s32.totalorder %s1008_s12, %s1008_s12 }
  0x30   :  { %v180_v10 = vsel %vm143_vm0, %v91_v6, 0.0  ;;  %983 = vmatprep.subr.bf16.mxu0 %v1032_v59  ;;  %v405_v6 = vld [vmem:[%s1624_s1 + $0x28] sm:$0xff]  ;;  %vm540_vm8 = vcmask 523712   ;;  %vm547_vm9 = vcmask 589312   ;;  %vm554_vm10 = vcmask 654912  }
  0x31   :  { %256 = vadd.xlane.f32.xlu1 %v255_v8  ;;  %v58_v8 = vld [vmem:[%s1623_s0 + $0x158] sm:$0xff]  ;;  %v315_v11 = vsel %vm143_vm0, %v136_v7, 0.0  ;;  %vm561_vm11 = vcmask 720512   ;;  %vm568_vm12 = vcmask 786112   ;;  %vm575_vm13 = vcmask 851712   ;;  %p1015_p3 = por %p1014_p2, %p1013_p1 }
  0x32   :  { %211 = vadd.xlane.f32.xlu0 %v210_v9  ;;  %v43_v9 = vld [vmem:[%s1623_s0 + $0xe0] sm:$0xff]  ;;  %v122_v12 = vmax.f32 %v58_v8, 0.0  ;;  %v330_v8 = vsel %vm143_vm0, %v141_v3, 0.0  ;;  %vm582_vm14 = vcmask 917312   ;;  %vm589_vm15 = vcmask 982912  }
  0x33   :  { %v107_v13 = vmax.f32 %v43_v9, 0.0  ;;  %p1016_p4 = pnand %p1015_p3, %p1009_p0 }
  0x34   :  { %v273_v16 = vsel %vm143_vm0, %v122_v12, 0.0 }
  0x35   :  { %166 = vadd.xlane.f32.xlu1 %v165_v14  ;;  %v28_v14 = vld [vmem:[%s1623_s0 + $0x68] sm:$0xff]  ;;  %v228_v17 = vsel %vm143_vm0, %v107_v13, 0.0  ;;  %v408_v13 = vld [vmem:[%s1624_s1 + $0x40] sm:$0xff] }
  0x36   :  { %301 = vadd.xlane.f32.xlu0 %v300_v15  ;;  %v73_v15 = vld [vmem:[%s1623_s0 + $0x1d0] sm:$0xff]  ;;  %v92_v18 = vmax.f32 %v28_v14, 0.0  ;;  %v409_v14 = vld [vmem:[%s1624_s1 + $0x48] sm:$0xff] }
  0x37   :  { %v137_v19 = vmax.f32 %v73_v15, 0.0  ;;  %v993_v15 = vpack.c.bf16 %v409_v14, %v408_v13 }
  0x38   :  { %v183_v22 = vsel %vm143_vm0, %v92_v18, 0.0 }
  0x39   :  { %259 = vadd.xlane.f32.xlu1 %v258_v20  ;;  %v59_v20 = vld [vmem:[%s1623_s0 + $0x160] sm:$0xff]  ;;  %v318_v23 = vsel %vm143_vm0, %v137_v19, 0.0  ;;  %v487_v19 = vlaneseq }
  0x3a   :  { %214 = vadd.xlane.f32.xlu0 %v213_v21  ;;  %v44_v21 = vld [vmem:[%s1623_s0 + $0xe8] sm:$0xff]  ;;  %v123_v24 = vmax.f32 %v59_v20, 0.0  ;;  %v412_v20 = vld [vmem:[%s1624_s1 + $0x60] sm:$0xff] }
  0x3b   :  { %v108_v25 = vmax.f32 %v44_v21, 0.0  ;;  %v413_v21 = vld [vmem:[%s1624_s1 + $0x68] sm:$0xff] }
  0x3c   :  { %v276_v28 = vsel %vm143_vm0, %v123_v24, 0.0  ;;  %v1356_v24 = vshrl.u32 %v487_v19, 7 }
  0x3d   :  { %169 = vadd.xlane.f32.xlu1 %v168_v26  ;;  %v29_v26 = vld [vmem:[%s1623_s0 + $0x70] sm:$0xff]  ;;  %v231_v29 = vsel %vm143_vm0, %v108_v25, 0.0 }
  0x3e   :  { %304 = vadd.xlane.f32.xlu0 %v303_v27  ;;  %v74_v27 = vld [vmem:[%s1623_s0 + $0x1d8] sm:$0xff]  ;;  %v93_v30 = vmax.f32 %v29_v26, 0.0  ;;  %v414_v25 = vld [vmem:[%s1624_s1 + $0x70] sm:$0xff] }
  0x3f   :  { %v138_v31 = vmax.f32 %v74_v27, 0.0  ;;  %v415_v26 = vld [vmem:[%s1624_s1 + $0x78] sm:$0xff] }
  0x40   :  { %v186_v34 = vsel %vm143_vm0, %v93_v30, 0.0 }
  0x41   :  { %262 = vadd.xlane.f32.xlu1 %v261_v32  ;;  %v60_v32 = vld [vmem:[%s1623_s0 + $0x168] sm:$0xff]  ;;  %v321_v35 = vsel %vm143_vm0, %v138_v31, 0.0  ;;  %v1034_v31 = vmov 0.0  }
  0x42   :  { %217 = vadd.xlane.f32.xlu0 %v216_v33  ;;  %v45_v33 = vld [vmem:[%s1623_s0 + $0xf0] sm:$0xff]  ;;  %v124_v36 = vmax.f32 %v60_v32, 0.0  ;;  %977 = vmatprep.mubr.msk.f32.mxu0 %vm1033_vm1, %v1034_v31  ;;  %vm835_vm1 = vcmask 1041409  }
  0x43   :  { %v109_v37 = vmax.f32 %v45_v33, 0.0 }
  0x44   :  { %v279_v40 = vsel %vm143_vm0, %v124_v36, 0.0 }
  0x45   :  { %172 = vadd.xlane.f32.xlu1 %v171_v38  ;;  %v30_v38 = vld [vmem:[%s1623_s0 + $0x78] sm:$0xff]  ;;  %v234_v41 = vsel %vm143_vm0, %v109_v37, 0.0 }
  0x46   :  { %307 = vadd.xlane.f32.xlu0 %v306_v39  ;;  %v75_v39 = vld [vmem:[%s1623_s0 + $0x1e0] sm:$0xff]  ;;  %v94_v42 = vmax.f32 %v30_v38, 0.0 }
  0x47   :  { %v139_v43 = vmax.f32 %v75_v39, 0.0 }
  0x48   :  { %v189_v46 = vsel %vm143_vm0, %v94_v42, 0.0 }
  0x49   :  { %265 = vadd.xlane.f32.xlu1 %v264_v44  ;;  %v61_v44 = vld [vmem:[%s1623_s0 + $0x170] sm:$0xff]  ;;  %v324_v47 = vsel %vm143_vm0, %v139_v43, 0.0 }
  0x4a   :  { %220 = vadd.xlane.f32.xlu0 %v219_v45  ;;  %v46_v45 = vld [vmem:[%s1623_s0 + $0xf8] sm:$0xff]  ;;  %v125_v48 = vmax.f32 %v61_v44, 0.0 }
  0x4b   :  { %v110_v49 = vmax.f32 %v46_v45, 0.0 }
  0x4c   :  { %v282_v55 = vsel %vm143_vm0, %v125_v48, 0.0 }
  0x4d   :  { %175 = vadd.xlane.f32.xlu1 %v174_v50  ;;  %v62_v50 = vld [vmem:[%s1623_s0 + $0x178] sm:$0xff] }
  0x4e   :  { %310 = vadd.xlane.f32.xlu0 %v309_v51  ;;  %v76_v51 = vld [vmem:[%s1623_s0 + $0x1e8] sm:$0xff] }
  0x4f   :  { %v140_v58 = vmax.f32 %v76_v51, 0.0 }
  0x51   :  { %268 = vadd.xlane.f32.xlu1 %v267_v56  ;;  %v237_v56 = vsel %vm143_vm0, %v110_v49, 0.0  ;;  %v327_v2 = vsel %vm143_vm0, %v140_v58, 0.0 }
  0x52   :  { %223 = vadd.xlane.f32.xlu0 %v222_v57  ;;  %v126_v57 = vmax.f32 %v62_v50, 0.0 }
  0x54   :  { %v285_v1 = vsel %vm143_vm0, %v126_v57, 0.0 }
  0x55   :  { %178 = vadd.xlane.f32.xlu1 %v177_v62  ;;  %v402_v62 = vld [vmem:[%s1624_s1 + $0x10] sm:$0xff] }
  0x56   :  { %313 = vadd.xlane.f32.xlu0 %v312_v63  ;;  %v403_v63 = vld [vmem:[%s1624_s1 + $0x18] sm:$0xff] }
  0x57   :  { %v984_v0 = vpack.c.bf16 %v403_v63, %v402_v62 }
  0x59   :  { %271 = vadd.xlane.f32.xlu1 %v270_v4  ;;  %v142_v4 = vmax.f32 %v78_v61, 0.0  ;;  %985 = vmatpush3.bf16.msra.mxu0 %v984_v0 }
  0x5a   :  { %226 = vadd.xlane.f32.xlu0 %v225_v5  ;;  %986 = vmatprep.subr.bf16.mxu0 %v1032_v59  ;;  %v404_v5 = vld [vmem:[%s1624_s1 + $0x20] sm:$0xff] }
  0x5b   :  { %v987_v7 = vpack.c.bf16 %v405_v6, %v404_v5  ;;  %v333_v9 = vsel %vm143_vm0, %v142_v4, 0.0  ;;  %vm596_vm0 = vcmask 1048512  }
  0x5d   :  { %181 = vadd.xlane.f32.xlu1 %v180_v10  ;;  %988 = vmatpush3.bf16.msra.mxu0 %v987_v7  ;;  %v406_v10 = vld [vmem:[%s1624_s1 + $0x30] sm:$0xff] }
  0x5e   :  { %316 = vadd.xlane.f32.xlu0 %v315_v11  ;;  %989 = vmatprep.subr.bf16.mxu0 %v1032_v59  ;;  %v407_v11 = vld [vmem:[%s1624_s1 + $0x38] sm:$0xff] }
  0x5f   :  { %v990_v12 = vpack.c.bf16 %v407_v11, %v406_v10 }
  0x61   :  { %274 = vadd.xlane.f32.xlu1 %v273_v16  ;;  %991 = vmatpush3.bf16.msra.mxu0 %v990_v12  ;;  %v410_v16 = vld [vmem:[%s1624_s1 + $0x50] sm:$0xff] }
  0x62   :  { %229 = vadd.xlane.f32.xlu0 %v228_v17  ;;  %992 = vmatprep.subr.bf16.mxu0 %v1032_v59  ;;  %v411_v17 = vld [vmem:[%s1624_s1 + $0x58] sm:$0xff] }
  0x63   :  { %v996_v18 = vpack.c.bf16 %v411_v17, %v410_v16 }
  0x65   :  { %184 = vadd.xlane.f32.xlu1 %v183_v22  ;;  %994 = vmatpush3.bf16.msra.mxu0 %v993_v15  ;;  %v999_v22 = vpack.c.bf16 %v413_v21, %v412_v20 }
  0x66   :  { %319 = vadd.xlane.f32.xlu0 %v318_v23  ;;  %995 = vmatprep.subr.bf16.mxu0 %v1032_v59  ;;  %v1354_v23 = vand.u32 127, %v487_v19 }
  0x68   :  { %v493_v27 = vadd.s32 4294967288, %v1354_v23  ;;  %v500_v32 = vadd.s32 4294967280, %v1354_v23  ;;  %v1368_v33 = vsub.s32 %v1354_v23, %v1356_v24  ;;  %v507_v54 = vadd.s32 4294967272, %v1354_v23 }
  0x69   :  { %277 = vadd.xlane.f32.xlu1 %v276_v28  ;;  %997 = vmatpush3.bf16.msra.mxu0 %v996_v18  ;;  %v1002_v28 = vpack.c.bf16 %v415_v26, %v414_v25  ;;  %v514_v7 = vadd.s32 4294967264, %v1354_v23  ;;  %v521_v26 = vadd.s32 4294967256, %v1354_v23 }
  0x6a   :  { %232 = vadd.xlane.f32.xlu0 %v231_v29  ;;  %998 = vmatprep.subr.bf16.mxu0 %v1032_v59  ;;  %v496_v36 = vsub.s32 %v493_v27, %v1356_v24  ;;  %v1385_v63 = vsub.s32 %v507_v54, %v1356_v24 }
  0x6b   :  { %v1395_v15 = vsub.s32 %v514_v7, %v1356_v24 }
  0x6d   :  { %187 = vadd.xlane.f32.xlu1 %v186_v34  ;;  %1000 = vmatpush3.bf16.msra.mxu0 %v999_v22 }
  0x6e   :  { %322 = vadd.xlane.f32.xlu0 %v321_v35  ;;  %1001 = vmatprep.subr.bf16.mxu0 %v1032_v59 }
  0x71   :  { %280 = vadd.xlane.f32.xlu1 %v279_v40  ;;  %1003 = vmatpush3.bf16.msra.mxu0 %v1002_v28 }
  0x72   :  { %235 = vadd.xlane.f32.xlu0 %v234_v41  ;;  %v1372_v41 = vsub.s32 %v500_v32, %v1356_v24 }
  0x75   :  { %190 = vadd.xlane.f32.xlu1 %v189_v46 }
  0x76   :  { %325 = vadd.xlane.f32.xlu0 %v324_v47 }
  0x79   :  { %283 = vadd.xlane.f32.xlu1 %v282_v55 }
  0x7a   :  { %238 = vadd.xlane.f32.xlu0 %v237_v56 }
  0x7d   :  { %286 = vadd.xlane.f32.xlu1 %v285_v1 }
  0x7e   :  { %328 = vadd.xlane.f32.xlu0 %v327_v2 }
  0x81   :  { %334 = vadd.xlane.f32.xlu1 %v333_v9 }
  0x82   :  { %331 = vadd.xlane.f32.xlu0 %v330_v8 }
  0x92   :  { %v194_v29 = vpop.xlane.xlu1 %193 }
  0x93   :  { %v146_v30 = vpop.xlane.xlu0 %145  ;;  %v352_v34 = vmul.f32 0.015625, %v194_v29 }
  0x94   :  { %v336_v35 = vmul.f32 0.015625, %v146_v30 }
  0x95   :  { %v601_v42 = vrot.slane %v352_v34, %v1368_v33 }
  0x96   :  { %v197_v37 = vpop.xlane.xlu1 %196  ;;  %v492_v43 = vrot.slane %v336_v35, %v1368_v33 }
  0x97   :  { %v149_v38 = vpop.xlane.xlu0 %148  ;;  %v353_v39 = vmul.f32 0.015625, %v197_v37  ;;  %v1406_v37 = vsub.s32 %v521_v26, %v1356_v24 }
  0x98   :  { %v337_v40 = vmul.f32 0.015625, %v149_v38 }
  0x99   :  { %v605_v44 = vrot.slane %v353_v39, %v496_v36 }
  0x9a   :  { %v497_v45 = vrot.slane %v337_v40, %v496_v36  ;;  %v200_v46 = vpop.xlane.xlu1 %199 }
  0x9b   :  { %v152_v47 = vpop.xlane.xlu0 %151  ;;  %v606_v48 = vsel %vm498_vm2, %v605_v44, %v601_v42  ;;  %v354_v50 = vmul.f32 0.015625, %v200_v46 }
  0x9c   :  { %v499_v49 = vsel %vm498_vm2, %v497_v45, %v492_v43  ;;  %v338_v51 = vmul.f32 0.015625, %v152_v47  ;;  %v528_v45 = vadd.s32 4294967248, %v1354_v23 }
  0x9d   :  { %v610_v52 = vrot.slane %v354_v50, %v1372_v41 }
  0x9e   :  { %v504_v53 = vrot.slane %v338_v51, %v1372_v41  ;;  %v245_v55 = vpop.xlane.xlu1 %244  ;;  %v1418_v54 = vsub.s32 %v528_v45, %v1356_v24 }
  0x9f   :  { %v242_v56 = vpop.xlane.xlu0 %241  ;;  %v611_v57 = vsel %vm505_vm3, %v610_v52, %v606_v48  ;;  %v369_v59 = vmul.f32 0.015625, %v245_v55 }
  0xa0   :  { %v506_v58 = vsel %vm505_vm3, %v504_v53, %v499_v49  ;;  %v368_v60 = vmul.f32 0.015625, %v242_v56 }
  0xa1   :  { %v684_v61 = vrot.slane %v369_v59, %v496_v36 }
  0xa2   :  { %v680_v62 = vrot.slane %v368_v60, %v1368_v33  ;;  %v203_v0 = vpop.xlane.xlu1 %202 }
  0xa3   :  { %v155_v1 = vpop.xlane.xlu0 %154  ;;  %v355_v3 = vmul.f32 0.015625, %v203_v0 }
  0xa4   :  { %v685_v2 = vsel %vm498_vm2, %v684_v61, %v680_v62  ;;  %v339_v4 = vmul.f32 0.015625, %v155_v1  ;;  %v535_v62 = vadd.s32 4294967240, %v1354_v23 }
  0xa5   :  { %v615_v5 = vrot.slane %v355_v3, %v1385_v63 }
  0xa6   :  { %v511_v6 = vrot.slane %v339_v4, %v1385_v63  ;;  %v290_v8 = vpop.xlane.xlu1 %289 }
  0xa7   :  { %v248_v9 = vpop.xlane.xlu0 %247  ;;  %v616_v10 = vsel %vm512_vm4, %v615_v5, %v611_v57  ;;  %v384_v13 = vmul.f32 0.015625, %v290_v8  ;;  %v1430_v8 = vsub.s32 %v535_v62, %v1356_v24  ;;  %v591_v62 = vadd.s32 4294967176, %v1354_v23 }
  0xa8   :  { %v513_v11 = vsel %vm512_vm4, %v511_v6, %v506_v58  ;;  %v370_v12 = vmul.f32 0.015625, %v248_v9 }
  0xa9   :  { %v759_v21 = vrot.slane %v384_v13, %v1368_v33 }
  0xaa   :  { %v689_v14 = vrot.slane %v370_v12, %v1372_v41  ;;  %v158_v16 = vpop.xlane.xlu1 %157 }
  0xab   :  { %v293_v17 = vpop.xlane.xlu0 %292  ;;  %v340_v19 = vmul.f32 0.015625, %v158_v16 }
  0xac   :  { %v690_v18 = vsel %vm505_vm3, %v689_v14, %v685_v2  ;;  %v385_v20 = vmul.f32 0.015625, %v293_v17 }
  0xad   :  { %v518_v22 = vrot.slane %v340_v19, %v1395_v15 }
  0xae   :  { %v763_v25 = vrot.slane %v385_v20, %v496_v36  ;;  %v251_v27 = vpop.xlane.xlu1 %250 }
  0xaf   :  { %v206_v28 = vpop.xlane.xlu0 %205  ;;  %v520_v29 = vsel %vm519_vm5, %v518_v22, %v513_v11  ;;  %v371_v31 = vmul.f32 0.015625, %v251_v27 }
  0xb0   :  { %v764_v30 = vsel %vm498_vm2, %v763_v25, %v759_v21  ;;  %v356_v32 = vmul.f32 0.015625, %v206_v28  ;;  %vm837_vm2 = vcmask 1042434  }
  0xb1   :  { %v694_v34 = vrot.slane %v371_v31, %v1385_v63 }
  0xb2   :  { %v620_v35 = vrot.slane %v356_v32, %v1395_v15  ;;  %v161_v33 = vpop.xlane.xlu1 %160 }
  0xb3   :  { %v296_v38 = vpop.xlane.xlu0 %295  ;;  %v695_v36 = vsel %vm512_vm4, %v694_v34, %v690_v18  ;;  %v341_v40 = vmul.f32 0.015625, %v161_v33 }
  0xb4   :  { %v621_v39 = vsel %vm519_vm5, %v620_v35, %v616_v10  ;;  %v386_v42 = vmul.f32 0.015625, %v296_v38 }
  0xb5   :  { %v525_v43 = vrot.slane %v341_v40, %v1406_v37 }
  0xb6   :  { %v768_v44 = vrot.slane %v386_v42, %v1372_v41  ;;  %v254_v46 = vpop.xlane.xlu1 %253  ;;  %v542_v42 = vadd.s32 4294967232, %v1354_v23 }
  0xb7   :  { %v209_v47 = vpop.xlane.xlu0 %208  ;;  %v527_v48 = vsel %vm526_vm6, %v525_v43, %v520_v29  ;;  %v372_v50 = vmul.f32 0.015625, %v254_v46  ;;  %v549_v43 = vadd.s32 4294967224, %v1354_v23  ;;  %v556_v46 = vadd.s32 4294967216, %v1354_v23 }
  0xb8   :  { %v769_v49 = vsel %vm505_vm3, %v768_v44, %v764_v30  ;;  %v357_v51 = vmul.f32 0.015625, %v209_v47  ;;  %vm839_vm3 = vcmask 1043459  }
  0xb9   :  { %v699_v52 = vrot.slane %v372_v50, %v1395_v15 }
  0xba   :  { %v625_v53 = vrot.slane %v357_v51, %v1406_v37  ;;  %v164_v55 = vpop.xlane.xlu1 %163  ;;  %v1470_v51 = vsub.s32 %v549_v43, %v1356_v24 }
  0xbb   :  { %v299_v56 = vpop.xlane.xlu0 %298  ;;  %v700_v41 = vsel %vm519_vm5, %v699_v52, %v695_v36  ;;  %v342_v58 = vmul.f32 0.015625, %v164_v55  ;;  %v570_v52 = vadd.s32 4294967200, %v1354_v23 }
  0xbc   :  { %v626_v57 = vsel %vm526_vm6, %v625_v53, %v621_v39  ;;  %v387_v59 = vmul.f32 0.015625, %v299_v56 }
  0xbd   :  { %v532_v60 = vrot.slane %v342_v58, %v1418_v54  ;;  %v584_v58 = vadd.s32 4294967184, %v1354_v23 }
  0xbe   :  { %v773_v61 = vrot.slane %v387_v59, %v1385_v63  ;;  %v257_v0 = vpop.xlane.xlu1 %256 }
  0xbf   :  { %v212_v1 = vpop.xlane.xlu0 %211  ;;  %v534_v2 = vsel %vm533_vm7, %v532_v60, %v527_v48  ;;  %v373_v4 = vmul.f32 0.015625, %v257_v0  ;;  %v1466_v48 = vsub.s32 %v542_v42, %v1356_v24 }
  0xc0   :  { %v774_v3 = vsel %vm512_vm4, %v773_v61, %v769_v49  ;;  %v358_v5 = vmul.f32 0.015625, %v212_v1  ;;  %v563_v49 = vadd.s32 4294967208, %v1354_v23  ;;  %v1480_v61 = vsub.s32 %v556_v46, %v1356_v24 }
  0xc1   :  { %v704_v6 = vrot.slane %v373_v4, %v1406_v37 }
  0xc2   :  { %v630_v7 = vrot.slane %v358_v5, %v1418_v54  ;;  %v167_v9 = vpop.xlane.xlu1 %166 }
  0xc3   :  { %v302_v10 = vpop.xlane.xlu0 %301  ;;  %v1433_v63 = vsel %vm526_vm6, %v704_v6, %v700_v41  ;;  %v343_v12 = vmul.f32 0.015625, %v167_v9 }
  0xc4   :  { %v1436_v11 = vsel %vm533_vm7, %v630_v7, %v626_v57  ;;  %v388_v13 = vmul.f32 0.015625, %v302_v10  ;;  %v577_v57 = vadd.s32 4294967192, %v1354_v23  ;;  %v1489_v7 = vsub.s32 %v570_v52, %v1356_v24 }
  0xc5   :  { %v539_v14 = vrot.slane %v343_v12, %v1430_v8 }
  0xc6   :  { %v778_v16 = vrot.slane %v388_v13, %v1395_v15  ;;  %v260_v17 = vpop.xlane.xlu1 %259  ;;  %v1496_v13 = vsub.s32 %v577_v57, %v1356_v24 }
  0xc7   :  { %v215_v18 = vpop.xlane.xlu0 %214  ;;  %v1441_v19 = vsel %vm540_vm8, %v539_v14, %v534_v2  ;;  %v374_v47 = vmul.f32 0.015625, %v260_v17  ;;  %v1499_v14 = vsub.s32 %v584_v58, %v1356_v24 }
  0xc8   :  { %v1444_v20 = vsel %vm519_vm5, %v778_v16, %v774_v3  ;;  %v359_v50 = vmul.f32 0.015625, %v215_v18  ;;  %v1485_v3 = vsub.s32 %v563_v49, %v1356_v24 }
  0xc9   :  { %v709_v0 = vrot.slane %v374_v47, %v1418_v54 }
  0xca   :  { %v170_v21 = vpop.xlane.xlu1 %169  ;;  %v635_v4 = vrot.slane %v359_v50, %v1430_v8 }
  0xcb   :  { %v305_v22 = vpop.xlane.xlu0 %304  ;;  %v344_v56 = vmul.f32 0.015625, %v170_v21  ;;  %v1504_v21 = vsub.s32 %v591_v62, %v1356_v24 }
  0xcc   :  { %v389_v41 = vmul.f32 0.015625, %v305_v22  ;;  %v710_v22 = vsel %vm533_vm7, %v709_v0, %v1433_v63 }
  0xcd   :  { %v546_v23 = vrot.slane %v344_v56, %v1466_v48 }
  0xce   :  { %v263_v25 = vpop.xlane.xlu1 %262  ;;  %v783_v12 = vrot.slane %v389_v41, %v1406_v37 }
  0xcf   :  { %v218_v26 = vpop.xlane.xlu0 %217  ;;  %v375_v59 = vmul.f32 0.015625, %v263_v25  ;;  %v548_v24 = vsel %vm547_vm9, %v546_v23, %v1441_v19 }
  0xd0   :  { %v360_v60 = vmul.f32 0.015625, %v218_v26  ;;  %v784_v63 = vsel %vm526_vm6, %v783_v12, %v1444_v20 }
  0xd1   :  { %v714_v16 = vrot.slane %v375_v59, %v1430_v8 }
  0xd2   :  { %v173_v27 = vpop.xlane.xlu1 %172  ;;  %v640_v17 = vrot.slane %v360_v60, %v1466_v48 }
  0xd3   :  { %v308_v28 = vpop.xlane.xlu0 %307  ;;  %v345_v1 = vmul.f32 0.015625, %v173_v27  ;;  %v636_v27 = vsel %vm540_vm8, %v635_v4, %v1436_v11  ;;  %v715_v11 = vsel %vm540_vm8, %v714_v16, %v710_v22 }
  0xd4   :  { %v390_v2 = vmul.f32 0.015625, %v308_v28  ;;  %v641_v43 = vsel %vm547_vm9, %v640_v17, %v636_v27 }
  0xd5   :  { %v553_v37 = vrot.slane %v345_v1, %v1470_v51 }
  0xd6   :  { %v266_v29 = vpop.xlane.xlu1 %265  ;;  %v788_v25 = vrot.slane %v390_v2, %v1418_v54 }
  0xd7   :  { %v221_v30 = vpop.xlane.xlu0 %220  ;;  %v376_v5 = vmul.f32 0.015625, %v266_v29  ;;  %v555_v47 = vsel %vm554_vm10, %v553_v37, %v548_v24 }
  0xd8   :  { %v361_v6 = vmul.f32 0.015625, %v221_v30  ;;  %v1529_v19 = vsel %vm533_vm7, %v788_v25, %v784_v63 }
  0xd9   :  { %v719_v28 = vrot.slane %v376_v5, %v1466_v48 }
  0xda   :  { %v176_v31 = vpop.xlane.xlu1 %175  ;;  %v645_v29 = vrot.slane %v361_v6, %v1470_v51 }
  0xdb   :  { %v1446_v32 = vpop.xlane.xlu0 %310  ;;  %v346_v18 = vmul.f32 0.015625, %v176_v31 }
  0xdc   :  { %v1521_v54 = vmul.f32 0.015625, %v1446_v32  ;;  %v646_v49 = vsel %vm554_vm10, %v645_v29, %v641_v43 }
  0xde   :  { %v269_v15 = vpop.xlane.xlu1 %268  ;;  %v793_v41 = vrot.slane %v1521_v54, %v1430_v8 }
  0xdf   :  { %v224_v34 = vpop.xlane.xlu0 %223  ;;  %v377_v26 = vmul.f32 0.015625, %v269_v15 }
  0xe0   :  { %v362_v30 = vmul.f32 0.015625, %v224_v34  ;;  %v560_v34 = vrot.slane %v346_v18, %v1480_v61 }
  0xe1   :  { %v724_v20 = vrot.slane %v377_v26, %v1470_v51 }
  0xe2   :  { %v179_v35 = vpop.xlane.xlu1 %178  ;;  %v650_v50 = vrot.slane %v362_v30, %v1480_v61  ;;  %v562_v59 = vsel %vm561_vm11, %v560_v34, %v555_v47 }
  0xe3   :  { %v1448_v33 = vpop.xlane.xlu0 %313  ;;  %v347_v15 = vmul.f32 0.015625, %v179_v35  ;;  %v720_v35 = vsel %vm547_vm9, %v719_v28, %v715_v11 }
  0xe4   :  { %v1541_v58 = vmul.f32 0.015625, %v1448_v33  ;;  %v725_v0 = vsel %vm554_vm10, %v724_v20, %v720_v35 }
  0xe5   :  { %v567_v57 = vrot.slane %v347_v15, %v1485_v3 }
  0xe6   :  { %v1450_v38 = vpop.xlane.xlu1 %271 }
  0xe7   :  { %v1452_v36 = vpop.xlane.xlu0 %226  ;;  %v378_v46 = vmul.f32 0.015625, %v1450_v38 }
  0xe8   :  { %v363_v32 = vmul.f32 0.015625, %v1452_v36 }
  0xe9   :  { %v729_v60 = vrot.slane %v378_v46, %v1480_v61 }
  0xea   :  { %v1454_v39 = vpop.xlane.xlu1 %181  ;;  %v655_v1 = vrot.slane %v363_v32, %v1485_v3 }
  0xeb   :  { %v1456_v40 = vpop.xlane.xlu0 %316  ;;  %v348_v52 = vmul.f32 0.015625, %v1454_v39 }
  0xec   :  { %v393_v2 = vmul.f32 0.015625, %v1456_v40  ;;  %v730_v40 = vsel %vm561_vm11, %v729_v60, %v725_v0 }
  0xed   :  { %v574_v4 = vrot.slane %v348_v52, %v1489_v7 }
  0xee   :  { %v1460_v44 = vpop.xlane.xlu1 %274  ;;  %v803_v25 = vrot.slane %v393_v2, %v1470_v51 }
  0xef   :  { %v1462_v45 = vpop.xlane.xlu0 %229  ;;  %v379_v36 = vmul.f32 0.015625, %v1460_v44  ;;  %v651_v44 = vsel %vm561_vm11, %v650_v50, %v646_v49 }
  0xf0   :  { %v364_v62 = vmul.f32 0.015625, %v1462_v45  ;;  %v569_v45 = vsel %vm568_vm12, %v567_v57, %v562_v59  ;;  %v656_v37 = vsel %vm568_vm12, %v655_v1, %v651_v44 }
  0xf1   :  { %v734_v16 = vrot.slane %v379_v36, %v1485_v3 }
  0xf2   :  { %v1473_v53 = vpop.xlane.xlu1 %184 }
  0xf3   :  { %v1475_v55 = vpop.xlane.xlu0 %319  ;;  %v349_v39 = vmul.f32 0.015625, %v1473_v53  ;;  %v798_v53 = vrot.slane %v1541_v58, %v1466_v48  ;;  %v576_v48 = vsel %vm575_vm13, %v574_v4, %v569_v45 }
  0xf4   :  { %v394_v28 = vmul.f32 0.015625, %v1475_v55 }
  0xf5   :  { %v581_v18 = vrot.slane %v349_v39, %v1496_v13 }
  0xf6   :  { %v1491_v9 = vpop.xlane.xlu1 %277  ;;  %v808_v35 = vrot.slane %v394_v28, %v1480_v61  ;;  %v794_v61 = vsel %vm540_vm8, %v793_v41, %v1529_v19 }
  0xf7   :  { %v233_v10 = vpop.xlane.xlu0 %232  ;;  %v380_v22 = vmul.f32 0.015625, %v1491_v9  ;;  %v735_v9 = vsel %vm568_vm12, %v734_v16, %v730_v40  ;;  %v583_v43 = vsel %vm582_vm14, %v581_v18, %v576_v48  ;;  %v799_v39 = vsel %vm547_vm9, %v798_v53, %v794_v61  ;;  %v927_v40 = vld [vmem:[%s1625_s2] ss:$0 sm:$0xff] }
  0xf8   :  { %v365_v33 = vmul.f32 0.015625, %v233_v10  ;;  %v660_v10 = vrot.slane %v364_v62, %v1489_v7 }
  0xf9   :  { %v739_v34 = vrot.slane %v380_v22, %v1489_v7 }
  0xfa   :  { %v188_v31 = vpop.xlane.xlu1 %187  ;;  %v665_v26 = vrot.slane %v365_v33, %v1496_v13  ;;  %v661_v11 = vsel %vm575_vm13, %v660_v10, %v656_v37  ;;  %v804_v33 = vsel %vm554_vm10, %v803_v25, %v799_v39 }
  0xfb   :  { %v1514_v42 = vpop.xlane.xlu0 %322  ;;  %v350_v5 = vmul.f32 0.015625, %v188_v31  ;;  %v740_v59 = vsel %vm575_vm13, %v739_v34, %v735_v9 }
  0xfc   :  { %v395_v55 = vmul.f32 0.015625, %v1514_v42  ;;  %v666_v46 = vsel %vm582_vm14, %v665_v26, %v661_v11 }
  0xfd   :  { %v588_v29 = vrot.slane %v350_v5, %v1499_v14 }
  0xfe   :  { %v281_v56 = vpop.xlane.xlu1 %280  ;;  %v813_v60 = vrot.slane %v395_v55, %v1485_v3  ;;  %v809_v3 = vsel %vm561_vm11, %v808_v35, %v804_v33 }
  0xff   :  { %v236_v38 = vpop.xlane.xlu0 %235  ;;  %v381_v27 = vmul.f32 0.015625, %v281_v56  ;;  %v590_v49 = vsel %vm589_vm15, %v588_v29, %v583_v43 }
 0x100   :  { %v366_v6 = vmul.f32 0.015625, %v236_v38 }
 0x101   :  { %v744_v47 = vrot.slane %v381_v27, %v1496_v13 }
 0x102   :  { %v191_v23 = vpop.xlane.xlu1 %190  ;;  %v670_v30 = vrot.slane %v366_v6, %v1499_v14  ;;  %v814_v6 = vsel %vm568_vm12, %v813_v60, %v809_v3 }
 0x103   :  { %v326_v12 = vpop.xlane.xlu0 %325  ;;  %v351_v17 = vmul.f32 0.015625, %v191_v23  ;;  %v745_v0 = vsel %vm582_vm14, %v744_v47, %v740_v59 }
 0x104   :  { %v396_v20 = vmul.f32 0.015625, %v326_v12  ;;  %v671_v50 = vsel %vm589_vm15, %v670_v30, %v666_v46 }
 0x105   :  { %v595_v63 = vrot.slane %v351_v17, %v1504_v21 }
 0x106   :  { %v284_v31 = vpop.xlane.xlu1 %283  ;;  %v818_v1 = vrot.slane %v396_v20, %v1489_v7 }
 0x107   :  { %v239_v24 = vpop.xlane.xlu0 %238  ;;  %v382_v15 = vmul.f32 0.015625, %v284_v31  ;;  %v597_v57 = vsel %vm596_vm0, %v595_v63, %v590_v49 }
 0x108   :  { %v367_v51 = vmul.f32 0.015625, %v239_v24  ;;  %v819_v23 = vsel %vm575_vm13, %v818_v1, %v814_v6 }
 0x109   :  { %v749_v52 = vrot.slane %v382_v15, %v1499_v14 }
 0x10a   :  { %v675_v32 = vrot.slane %v367_v51, %v1504_v21  ;;  %v287_v56 = vpop.xlane.xlu1 %286 }
 0x10b   :  { %v329_v38 = vpop.xlane.xlu0 %328  ;;  %v383_v58 = vmul.f32 0.015625, %v287_v56  ;;  %v750_v8 = vsel %vm589_vm15, %v749_v52, %v745_v0 }
 0x10c   :  { %v676_v42 = vsel %vm596_vm0, %v675_v32, %v671_v50  ;;  %v397_v36 = vmul.f32 0.015625, %v329_v38 }
 0x10d   :  { %v836_v62 = vsel %vm835_vm1, %v676_v42, %v597_v57  ;;  %v754_v2 = vrot.slane %v383_v58, %v1504_v21 }
 0x10e   :  { %v823_v54 = vrot.slane %v397_v36, %v1496_v13  ;;  %v335_v41 = vpop.xlane.xlu1 %334 }
 0x10f   :  { %v332_v19 = vpop.xlane.xlu0 %331  ;;  %v399_v4 = vmul.f32 0.015625, %v335_v41  ;;  %v755_v5 = vsel %vm596_vm0, %v754_v2, %v750_v8 }
 0x110   :  { %v398_v44 = vmul.f32 0.015625, %v332_v19  ;;  %v838_v7 = vsel %vm837_vm2, %v755_v5, %v836_v62  ;;  %v824_v13 = vsel %vm582_vm14, %v823_v54, %v819_v23 }
 0x111   :  { %v833_v45 = vrot.slane %v399_v4, %v1504_v21 }
 0x112   :  { %v828_v12 = vrot.slane %v398_v44, %v1499_v14 }
 0x114   :  { %v829_v53 = vsel %vm589_vm15, %v828_v12, %v824_v13 }
 0x115   :  { %v834_v16 = vsel %vm596_vm0, %v833_v45, %v829_v53 }
 0x116   :  { %v840_v17 = vsel %vm839_vm3, %v834_v16, %v838_v7 }
 0x117   :  { %978 = vmatmul.mubr.f32.vlgmr.msra.gmra.mrb[0].mxu0 %v840_v17 }
 0x1ea   :  { %v908_v10 = vpop.f32.mrb[0].mxu0 }
 0x1eb   :  { %v909_v18 = vadd.f32 %v927_v40, %v908_v10  ;;  %v979_v14 = vpop.f32.mrb[1].mxu0 }
 0x1ed   :  { %912 = vst [vmem:[#allocation2] sm:$0xf] %v909_v18 }
 0x1ee   :  { %1019 = shalt.err (!%p1016_p4)
}
 0x1ef   :  { %s1020_s14 = scalar_lea.hbm %s1626_s3, 64 }
 0x1f0   :  { %p1021_p5 = scmp.ne.s32.totalorder %s1626_s3, %s1020_s14  ;;  %p1024_p6 = scmp.lt.u32.totalorder %s1020_s14, %s1626_s3 }
 0x1f2   :  { %p1026_p7 = pnand %p1024_p6, %p1021_p5 }
 0x1f4   :  { %1029 = shalt.err (!%p1026_p7)
}
 0x1f5   :  { %922 = dma.vmem_to_hbm [thread:$0]  %s920_s11, 64, %s1626_s3, [#allocation3]  }
 0x1f6   :  { %1030 = dma.done.wait [#allocation3], 64  }
 0x1f7   :  { %1031 = vsyncadd [#allocation3], 4294967232 }
 0x1f8   :  { %926 = vsyncpa [#allocation3], 1 }

</bundles_post_ra>
